<compile_context>
chip_gen: v7x
topology: tpu7x:2x2x1
jax: 0.10.0
libtpu: 0.0.40
codegen_flags: <defaults>
</compile_context>

<pallas_src>
import jax
import jax.numpy as jnp
from jax.experimental import pallas as pl
from jax.experimental.pallas import tpu as pltpu


def vae_decoder_kernel(x_ref, w1_ref, b1_ref, w2_ref, b2_ref, o_ref):
    # fc1: bf16 operands on the MXU, f32 accumulation.
    h1 = jnp.dot(
        x_ref[...].astype(jnp.bfloat16),
        w1_ref[...].astype(jnp.bfloat16),
        preferred_element_type=jnp.float32,
    )
    # Bias + ReLU in f32 (v5e-friendly elementwise path).
    h1 = jnp.maximum(h1 + b1_ref[...], 0.0)

    # fc2: bf16 operands, f32 accumulation, then bias in f32.
    z = jnp.dot(
        h1.astype(jnp.bfloat16),
        w2_ref[...].astype(jnp.bfloat16),
        preferred_element_type=jnp.float32,
    )
    z = z + b2_ref[...]

    # sigmoid(z) == 0.5*tanh(0.5*z) + 0.5  (keeps the activation on the EUP slot).
    o_ref[...] = (0.5 * jnp.tanh(0.5 * z) + 0.5).astype(o_ref.dtype)


def vae_decoder_forward(x, w1, b1, w2, b2):
    """x: (B, E); w1: (E, H); b1: (1, H); w2: (H, D); b2: (1, D) -> (B, D)."""
    B, E = x.shape
    H = w1.shape[1]
    D = w2.shape[1]

    itemsize = jnp.dtype(x.dtype).itemsize
    cost = pl.CostEstimate(
        flops=2 * B * (E * H + H * D),
        transcendentals=B * D,  # tanh in the sigmoid
        bytes_accessed=itemsize * (B * E + E * H + H + H * D + D + B * D),
    )

    vmem = pl.BlockSpec(memory_space=pltpu.MemorySpace.VMEM)  # full-array VMEM block
    return pl.pallas_call(
        vae_decoder_kernel,
        out_shape=jax.ShapeDtypeStruct((B, D), x.dtype),
        in_specs=[vmem, vmem, vmem, vmem, vmem],
        out_specs=vmem,
        cost_estimate=cost,
    )(x, w1, b1, w2, b2)


def reference_forward(x, w1, b1, w2, b2):
    h1 = jnp.maximum(x @ w1 + b1, 0.0)
    return jax.nn.sigmoid(h1 @ w2 + b2)


if __name__ == "__main__":
    # Small shapes consistent with the module.
    img_size = 16
    encoding_dim = 32
    batch = 2

    E = encoding_dim
    H = encoding_dim * 2                 # fc1 out = 64
    D = 3 * img_size * img_size          # fc2 out = input_size = 768

    key = jax.random.PRNGKey(0)
    kx, k1w, k1b, k2w, k2b = jax.random.split(key, 5)

    # Deterministic parameter init (PyTorch Linear-style uniform bounds),
    # stored pre-transposed as (in, out).
    bound1 = 1.0 / jnp.sqrt(E)
    bound2 = 1.0 / jnp.sqrt(H)
    w1 = jax.random.uniform(k1w, (E, H), jnp.float32, -bound1, bound1)
    b1 = jax.random.uniform(k1b, (1, H), jnp.float32, -bound1, bound1)
    w2 = jax.random.uniform(k2w, (H, D), jnp.float32, -bound2, bound2)
    b2 = jax.random.uniform(k2b, (1, D), jnp.float32, -bound2, bound2)

    x = jax.random.normal(kx, (batch, E), jnp.float32)

    out = vae_decoder_forward(x, w1, b1, w2, b2)
    out = jax.block_until_ready(out)

    ref = reference_forward(x, w1, b1, w2, b2)
    assert out.shape == (batch, D)
    # bf16 MXU operands with f32 accumulation: expect ~1e-3-level deviation
    # pre-sigmoid, smaller after the bounded activation.
    assert jnp.allclose(out, ref, atol=2e-2, rtol=2e-2), float(jnp.abs(out - ref).max())

    print("KERNEL_OK")
</pallas_src>

<mosaic_0001>
module attributes {stable_mosaic.version = 11 : i64} {
  func.func @vae_decoder_kernel(%arg0: memref<2x32xf32, #tpu.memory_space<vmem>>, %arg1: memref<32x64xf32, #tpu.memory_space<vmem>>, %arg2: memref<1x64xf32, #tpu.memory_space<vmem>>, %arg3: memref<64x768xf32, #tpu.memory_space<vmem>>, %arg4: memref<1x768xf32, #tpu.memory_space<vmem>>, %arg5: memref<2x768xf32, #tpu.memory_space<vmem>>) attributes {dimension_semantics = [], scalar_prefetch = 0 : i64, scratch_operands = 0 : i64, tpu.core_type = #tpu.core_type<tc>} {
    %c0 = arith.constant 0 : index
    %c0_0 = arith.constant 0 : index
    %0 = vector.load %arg0[%c0, %c0_0] : memref<2x32xf32, #tpu.memory_space<vmem>>, vector<2x32xf32>
    %1 = arith.truncf %0 : vector<2x32xf32> to vector<2x32xbf16>
    %c0_1 = arith.constant 0 : index
    %c0_2 = arith.constant 0 : index
    %2 = vector.load %arg1[%c0_1, %c0_2] : memref<32x64xf32, #tpu.memory_space<vmem>>, vector<32x64xf32>
    %3 = arith.truncf %2 : vector<32x64xf32> to vector<32x64xbf16>
    %cst = arith.constant dense<0.000000e+00> : vector<2x64xf32>
    %4 = tpu.matmul %1, %3, %cst {dimension_numbers = #tpu.dot_dimension_numbers<[1], [0], [0], [1], [0, 0, 1, 1], [], []>} : vector<2x32xbf16>, vector<32x64xbf16>, vector<2x64xf32> -> vector<2x64xf32>
    %c0_3 = arith.constant 0 : index
    %c0_4 = arith.constant 0 : index
    %5 = vector.load %arg2[%c0_3, %c0_4] : memref<1x64xf32, #tpu.memory_space<vmem>>, vector<1x64xf32>
    %6 = vector.broadcast %5 : vector<1x64xf32> to vector<2x64xf32>
    %7 = arith.addf %4, %6 : vector<2x64xf32>
    %cst_5 = arith.constant 0.000000e+00 : f32
    %8 = vector.broadcast %cst_5 : f32 to vector<2x64xf32>
    %9 = arith.maximumf %7, %8 : vector<2x64xf32>
    %10 = arith.truncf %9 : vector<2x64xf32> to vector<2x64xbf16>
    %c0_6 = arith.constant 0 : index
    %c0_7 = arith.constant 0 : index
    %11 = vector.load %arg3[%c0_6, %c0_7] : memref<64x768xf32, #tpu.memory_space<vmem>>, vector<64x768xf32>
    %12 = arith.truncf %11 : vector<64x768xf32> to vector<64x768xbf16>
    %cst_8 = arith.constant dense<0.000000e+00> : vector<2x768xf32>
    %13 = tpu.matmul %10, %12, %cst_8 {dimension_numbers = #tpu.dot_dimension_numbers<[1], [0], [0], [1], [0, 0, 1, 1], [], []>} : vector<2x64xbf16>, vector<64x768xbf16>, vector<2x768xf32> -> vector<2x768xf32>
    %c0_9 = arith.constant 0 : index
    %c0_10 = arith.constant 0 : index
    %14 = vector.load %arg4[%c0_9, %c0_10] : memref<1x768xf32, #tpu.memory_space<vmem>>, vector<1x768xf32>
    %15 = vector.broadcast %14 : vector<1x768xf32> to vector<2x768xf32>
    %16 = arith.addf %13, %15 : vector<2x768xf32>
    %cst_11 = arith.constant 5.000000e-01 : f32
    %17 = vector.broadcast %cst_11 : f32 to vector<2x768xf32>
    %18 = arith.mulf %17, %16 : vector<2x768xf32>
    %19 = math.tanh %18 : vector<2x768xf32>
    %cst_12 = arith.constant 5.000000e-01 : f32
    %20 = vector.broadcast %cst_12 : f32 to vector<2x768xf32>
    %21 = arith.mulf %20, %19 : vector<2x768xf32>
    %cst_13 = arith.constant 5.000000e-01 : f32
    %22 = vector.broadcast %cst_13 : f32 to vector<2x768xf32>
    %23 = arith.addf %21, %22 : vector<2x768xf32>
    %c0_14 = arith.constant 0 : index
    %c0_15 = arith.constant 0 : index
    %24 = vector.load %arg5[%c0_14, %c0_15] : memref<2x768xf32, #tpu.memory_space<vmem>>, vector<2x768xf32>
    tpu.vector_store %arg5[%c0_14, %c0_15], %23 {strides = array<i32>} : memref<2x768xf32, #tpu.memory_space<vmem>>, vector<2x768xf32>,
    return
  }
}

</mosaic_0001>

<bundles_post_ra>
// kernel: tpu_custom_call.1
= control target key start
LH: loop header
LB: loop body
LE: loop exit
PB: predicated region body
PF: predicated region fallthrough
CT: control target
= control target key end

     0   :  { %10 = vsyncpa [#allocation3], 0  ;;  %s662_s0 = inlined_call_operand.hbm [shape: f32[2,32], index: 0, kind: input, shape index: {}]   ;;  %s663_s1 = inlined_call_operand.hbm [shape: f32[32,64], index: 1, kind: input, shape index: {}]   ;;  %s664_s2 = inlined_call_operand.vmem [shape: f32[1,64], index: 2, kind: input, shape index: {}]   ;;  %s665_s3 = inlined_call_operand.hbm [shape: f32[64,768], index: 3, kind: input, shape index: {}]   ;;  %s666_s4 = inlined_call_operand.vmem [shape: f32[1,768], index: 4, kind: input, shape index: {}]   ;;  %s667_s5 = inlined_call_operand.hbm [shape: f32[2,768], index: 5, kind: output, shape index: {}]  }
   0x1   :  { %11 = vsyncpa [#allocation6], 0 }
   0x2   :  { %12 = vsyncpa [#allocation4], 0  ;;  %s563_s18 = smov [#allocation5]   ;;  %s469_s22 = scalar_lea.hbm %s663_s1, 512 }
   0x3   :  { %s28_s19 = sshll.u32 %s563_s18, 4  ;;  %p470_p0 = scmp.ne.s32.totalorder %s663_s1, %s469_s22  ;;  %s29_s19 = int_to_ptr.vmem [resolvable:$true] %s28_s19 }
   0x4   :  { %p473_p1 = scmp.lt.u32.totalorder %s469_s22, %s663_s1 }
   0x6   :  { %p475_p2 = pnand %p473_p1, %p470_p0 }
   0x8   :  { %478 = shalt.err (!%p475_p2)
}
   0x9   :  { %s479_s27 = scalar_lea.vmem %s29_s19, 512  ;;  %p484_p4 = scmp.lt.s32.totalorder %s29_s19, %s29_s19 }
   0xa   :  { %p480_p3 = scmp.ne.s32.totalorder %s29_s19, %s479_s27  ;;  %p485_p5 = scmp.lt.s32.totalorder %s479_s27, %s479_s27 }
   0xc   :  { %p486_p6 = por %p485_p5, %p484_p4 }
   0xe   :  { %p487_p7 = pnand %p486_p6, %p480_p3 }
  0x10   :  { %490 = shalt.err (!%p487_p7)
}
  0x11   :  { %s564_s28 = smov 128   ;;  %s565_s29 = smov 8  }
  0x12   :  { %34 = dma.hbm_to_vmem [thread:$0]  %s663_s1, 512, %s29_s19, [#allocation6], %s564_s28, %s564_s28, %s565_s29  }
  0x13   :  { %s566_s7 = smov [#allocation2]   ;;  %s567_s9 = smov [#allocation7]  }
  0x14   :  { %s19_s8 = sshll.u32 %s566_s7, 4  ;;  %s42_s10 = sshll.u32 %s567_s9, 4  ;;  %s20_s8 = int_to_ptr.vmem [resolvable:$true] %s19_s8  ;;  %s43_s10 = int_to_ptr.vmem [resolvable:$true] %s42_s10 }
  0x15   :  { %s491_s13 = scalar_lea.hbm %s662_s0, 32 }
  0x16   :  { %p492_p8 = scmp.ne.s32.totalorder %s662_s0, %s491_s13  ;;  %p495_p9 = scmp.lt.u32.totalorder %s491_s13, %s662_s0 }
  0x18   :  { %p497_p10 = pnand %p495_p9, %p492_p8 }
  0x1a   :  { %500 = shalt.err (!%p497_p10)
}
  0x1b   :  { %s501_s1 = scalar_lea.vmem %s20_s8, 32  ;;  %p506_p12 = scmp.lt.s32.totalorder %s20_s8, %s20_s8 }
  0x1c   :  { %p502_p11 = scmp.ne.s32.totalorder %s20_s8, %s501_s1  ;;  %p507_p13 = scmp.lt.s32.totalorder %s501_s1, %s501_s1 }
  0x1e   :  { %p508_p0 = por %p507_p13, %p506_p12 }
  0x20   :  { %p509_p1 = pnand %p508_p0, %p502_p11 }
  0x22   :  { %512 = shalt.err (!%p509_p1)
}
  0x23   :  { %22 = dma.hbm_to_vmem [thread:$0]  %s662_s0, 32, %s20_s8, [#allocation3]  }
  0x24   :  { %s513_s22 = scalar_lea.hbm %s665_s3, 6144 }
  0x25   :  { %p514_p2 = scmp.ne.s32.totalorder %s665_s3, %s513_s22  ;;  %p517_p3 = scmp.lt.u32.totalorder %s513_s22, %s665_s3 }
  0x27   :  { %p519_p4 = pnand %p517_p3, %p514_p2 }
  0x29   :  { %522 = shalt.err (!%p519_p4)
}
  0x2a   :  { %s523_s27 = scalar_lea.vmem %s43_s10, 6144  ;;  %p528_p6 = scmp.lt.s32.totalorder %s43_s10, %s43_s10 }
  0x2b   :  { %p524_p5 = scmp.ne.s32.totalorder %s43_s10, %s523_s27  ;;  %p529_p7 = scmp.lt.s32.totalorder %s523_s27, %s523_s27 }
  0x2d   :  { %p530_p8 = por %p529_p7, %p528_p6 }
  0x2f   :  { %p531_p9 = pnand %p530_p8, %p524_p5 }
  0x31   :  { %534 = shalt.err (!%p531_p9)
}
  0x32   :  { %s568_s0 = smov 768   ;;  %s569_s28 = smov 48  }
  0x33   :  { %48 = dma.hbm_to_vmem [thread:$0]  %s665_s3, 6144, %s43_s10, [#allocation6], %s568_s0, %s568_s0, %s569_s28  }
  0x34   :  { %557 = dma.done.wait [#allocation3], 32  }
  0x35   :  { %558 = vsyncadd [#allocation3], 4294967264 }
  0x36   :  { %559 = dma.done.wait [#allocation6], 6656  }
  0x37   :  { %560 = vsyncadd [#allocation6], 4294960640  ;;  %v570_v0 = vmov 0.0   ;;  %vm571_vm0 = vmmov 0   ;;  %v63_v1 = vld [vmem:[#allocation5] sm:$0xff]  ;;  %v64_v2 = vld [vmem:[#allocation5 + $0x8] sm:$0xff] }
  0x38   :  { %437 = vmatprep.subr.bf16.mxu0 %v570_v0  ;;  %441 = vmatprep.mubr.msk.bf16.mxu0 %vm571_vm0, %v570_v0  ;;  %v65_v3 = vld [vmem:[#allocation5 + $0x10] sm:$0xff]  ;;  %v67_v4 = vpack.c.bf16 %v64_v2, %v63_v1  ;;  %v66_v5 = vld [vmem:[#allocation5 + $0x18] sm:$0xff]  ;;  %v123_v7 = vld [vmem:[#allocation7 + $0x8] sm:$0xff]  ;;  %vm76_vm1 = vcmask 261120   ;;  %v572_v60 = vmov 0   ;;  %vm226_vm2 = vcmask 523264  }
  0x39   :  { %v61_v6 = vld [vmem:[#allocation2] sm:$0x3]  ;;  %v122_v9 = vld [vmem:[#allocation7] sm:$0xff]  ;;  %v128_v10 = vld [vmem:[#allocation7 + $0x30] sm:$0xff]  ;;  %v68_v11 = vpack.c.bf16 %v66_v5, %v65_v3  ;;  %262 = vmatprep.mubr.bf16.mxu1 %v572_v60 }
  0x3a   :  { %v129_v8 = vld [vmem:[#allocation7 + $0x38] sm:$0xff]  ;;  %438 = vmatpush3.bf16.msra.mxu0 %v67_v4  ;;  %v170_v13 = vpack.c.bf16 %v128_v10, %v122_v9  ;;  %v131_v15 = vld [vmem:[#allocation7 + $0x48] sm:$0xff]  ;;  %v124_v16 = vld [vmem:[#allocation7 + $0x10] sm:$0xff]  ;;  %v62_v25 = vpack.c.bf16 %v61_v6, %v61_v6 }
  0x3b   :  { %v171_v12 = vpack.c.bf16 %v129_v8, %v123_v7  ;;  %v125_v14 = vld [vmem:[#allocation7 + $0x18] sm:$0xff]  ;;  %439 = vmatprep.subr.bf16.mxu0 %v570_v0  ;;  %v130_v18 = vld [vmem:[#allocation7 + $0x40] sm:$0xff]  ;;  %v135_v19 = vld [vmem:[#allocation7 + $0x68] sm:$0xff] }
  0x3c   :  { %v173_v17 = vpack.c.bf16 %v131_v15, %v125_v14  ;;  %v141_v20 = vld [vmem:[#allocation7 + $0x98] sm:$0xff]  ;;  %v134_v22 = vld [vmem:[#allocation7 + $0x60] sm:$0xff]  ;;  %v140_v23 = vld [vmem:[#allocation7 + $0x90] sm:$0xff]  ;;  %v172_v28 = vpack.c.bf16 %v130_v18, %v124_v16 }
  0x3d   :  { %230 = vmatprep.subr.bf16.mxu1 %v171_v12  ;;  %v177_v21 = vpack.c.bf16 %v141_v20, %v135_v19  ;;  %v137_v24 = vld [vmem:[#allocation7 + $0x78] sm:$0xff]  ;;  %v176_v26 = vpack.c.bf16 %v140_v23, %v134_v22  ;;  %v143_v27 = vld [vmem:[#allocation7 + $0xa8] sm:$0xff]  ;;  %v146_v31 = vld [vmem:[#allocation7 + $0xc0] sm:$0xff] }
  0x3e   :  { %231 = vmatpush1.bf16.msra.mxu1 %v170_v13  ;;  %440 = vmatpush3.bf16.msra.mxu0 %v68_v11  ;;  %v147_v29 = vld [vmem:[#allocation7 + $0xc8] sm:$0xff]  ;;  %v153_v30 = vld [vmem:[#allocation7 + $0xf8] sm:$0xff]  ;;  %v179_v32 = vpack.c.bf16 %v143_v27, %v137_v24  ;;  %v136_v33 = vld [vmem:[#allocation7 + $0x70] sm:$0xff] }
  0x3f   :  { %232 = vmatprep.subr.bf16.mxu1 %v177_v21  ;;  %271 = vmatprep.subr.bf16.mxu0 %v173_v17  ;;  %v142_v34 = vld [vmem:[#allocation7 + $0xa0] sm:$0xff]  ;;  %v183_v35 = vpack.c.bf16 %v153_v30, %v147_v29  ;;  %v152_v36 = vld [vmem:[#allocation7 + $0xf0] sm:$0xff]  ;;  %v149_v37 = vld [vmem:[#allocation7 + $0xd8] sm:$0xff] }
  0x40   :  { %v155_v38 = vld [vmem:[#allocation7 + $0x108] sm:$0xff]  ;;  %v182_v39 = vpack.c.bf16 %v152_v36, %v146_v31  ;;  %v178_v40 = vpack.c.bf16 %v142_v34, %v136_v33  ;;  %v148_v42 = vld [vmem:[#allocation7 + $0xd0] sm:$0xff]  ;;  %v154_v43 = vld [vmem:[#allocation7 + $0x100] sm:$0xff] }
  0x41   :  { %442 = vmatmul.mubr.msk.bf16.vlgmr.msra.gmra.mrb[0].mxu0 %vm76_vm1, %v62_v25  ;;  %v185_v41 = vpack.c.bf16 %v155_v38, %v149_v37  ;;  %v184_v44 = vpack.c.bf16 %v154_v43, %v148_v42  ;;  %v159_v45 = vld [vmem:[#allocation7 + $0x128] sm:$0xff]  ;;  %v165_v46 = vld [vmem:[#allocation7 + $0x158] sm:$0xff]  ;;  %v158_v48 = vld [vmem:[#allocation7 + $0x120] sm:$0xff] }
  0x42   :  { %233 = vmatpush1.bf16.msra.mxu1 %v176_v26  ;;  %272 = vmatpush1.bf16.msra.mxu0 %v172_v28  ;;  %v189_v47 = vpack.c.bf16 %v165_v46, %v159_v45  ;;  %v164_v49 = vld [vmem:[#allocation7 + $0x150] sm:$0xff]  ;;  %v161_v50 = vld [vmem:[#allocation7 + $0x138] sm:$0xff]  ;;  %v167_v52 = vld [vmem:[#allocation7 + $0x168] sm:$0xff]  ;;  %v196_v26 = vlaneseq }
  0x43   :  { %234 = vmatprep.subr.bf16.mxu1 %v183_v35  ;;  %273 = vmatprep.subr.bf16.mxu0 %v179_v32  ;;  %v188_v51 = vpack.c.bf16 %v164_v49, %v158_v48  ;;  %v160_v53 = vld [vmem:[#allocation7 + $0x130] sm:$0xff]  ;;  %v166_v54 = vld [vmem:[#allocation7 + $0x160] sm:$0xff]  ;;  %v191_v55 = vpack.c.bf16 %v167_v52, %v161_v50  ;;  %v127_v57 = vld [vmem:[#allocation7 + $0x28] sm:$0xff] }
  0x44   :  { %v190_v56 = vpack.c.bf16 %v166_v54, %v160_v53  ;;  %v133_v58 = vld [vmem:[#allocation7 + $0x58] sm:$0xff]  ;;  %303 = vmatprep.mubr.bf16.mxu0 %v572_v60  ;;  %v428_v61 = vld [vmem:[%s664_s2] ss:$0 sm:$0xff]  ;;  %v126_v1 = vld [vmem:[#allocation7 + $0x20] sm:$0xff]  ;;  %v197_v27 = vshrl.u32 %v196_v26, 7 }
  0x45   :  { %v175_v59 = vpack.c.bf16 %v133_v58, %v127_v57  ;;  %v132_v2 = vld [vmem:[#allocation7 + $0x50] sm:$0xff]  ;;  %v139_v4 = vld [vmem:[#allocation7 + $0x88] sm:$0xff]  ;;  %v145_v5 = vld [vmem:[#allocation7 + $0xb8] sm:$0xff] }
  0x46   :  { %235 = vmatpush1.bf16.msra.mxu1 %v182_v39  ;;  %274 = vmatpush1.bf16.msra.mxu0 %v178_v40  ;;  %v174_v8 = vpack.c.bf16 %v132_v2, %v126_v1  ;;  %v181_v10 = vpack.c.bf16 %v145_v5, %v139_v4  ;;  %v138_v11 = vld [vmem:[#allocation7 + $0x80] sm:$0xff]  ;;  %v144_v12 = vld [vmem:[#allocation7 + $0xb0] sm:$0xff]  ;;  %v151_v13 = vld [vmem:[#allocation7 + $0xe8] sm:$0xff]  ;;  %v198_v28 = vsub.s32 0, %v197_v27  ;;  %v206_v29 = vsub.s32 2, %v197_v27 }
  0x47   :  { %275 = vmatprep.subr.bf16.mxu0 %v185_v41  ;;  %236 = vmatprep.subr.bf16.mxu1 %v189_v47  ;;  %v157_v14 = vld [vmem:[#allocation7 + $0x118] sm:$0xff]  ;;  %v180_v15 = vpack.c.bf16 %v144_v12, %v138_v11  ;;  %v150_v17 = vld [vmem:[#allocation7 + $0xe0] sm:$0xff]  ;;  %v156_v18 = vld [vmem:[#allocation7 + $0x110] sm:$0xff]  ;;  %v202_v31 = vsub.s32 1, %v197_v27  ;;  %v210_v32 = vsub.s32 3, %v197_v27  ;;  %v214_v53 = vsub.s32 4, %v197_v27 }
  0x48   :  { %v187_v16 = vpack.c.bf16 %v157_v14, %v151_v13  ;;  %v163_v19 = vld [vmem:[#allocation7 + $0x148] sm:$0xff]  ;;  %v169_v20 = vld [vmem:[#allocation7 + $0x178] sm:$0xff]  ;;  %v186_v21 = vpack.c.bf16 %v156_v18, %v150_v17  ;;  %v162_v23 = vld [vmem:[#allocation7 + $0x140] sm:$0xff]  ;;  %v218_v54 = vsub.s32 5, %v197_v27 }
  0x49   :  { %v193_v22 = vpack.c.bf16 %v169_v20, %v163_v19  ;;  %v168_v24 = vld [vmem:[#allocation7 + $0x170] sm:$0xff] }
  0x4a   :  { %276 = vmatpush1.bf16.msra.mxu0 %v184_v44  ;;  %237 = vmatpush1.bf16.msra.mxu1 %v188_v51  ;;  %v192_v25 = vpack.c.bf16 %v168_v24, %v162_v23  ;;  %v194_v30 = vld [vmem:[%s666_s4] sm:$0x3f]  ;;  %s574_s4 = smov [#allocation8]  }
  0x4b   :  { %277 = vmatprep.subr.bf16.mxu0 %v191_v55  ;;  %312 = vmatprep.subr.bf16.mxu1 %v175_v59  ;;  %v199_v33 = vrot.slane %v194_v30, %v198_v28  ;;  %v207_v34 = vrot.slane %v194_v30, %v206_v29  ;;  %v203_v35 = vrot.slane %v194_v30, %v202_v31  ;;  %v573_v55 = vmov 1983009808   ;;  %s418_s8 = sshll.u32 %s574_s4, 4  ;;  %s419_s8 = int_to_ptr.vmem [resolvable:$true] %s418_s8 }
  0x4c   :  { %v211_v36 = vrot.slane %v194_v30, %v210_v32  ;;  %v215_v57 = vrot.slane %v194_v30, %v214_v53  ;;  %v219_v58 = vrot.slane %v194_v30, %v218_v54  ;;  %s535_s9 = scalar_lea.vmem %s419_s8, 192  ;;  %p540_p11 = scmp.lt.s32.totalorder %s419_s8, %s419_s8 }
  0x4d   :  { %p536_p10 = scmp.ne.s32.totalorder %s419_s8, %s535_s9  ;;  %p541_p12 = scmp.lt.s32.totalorder %s535_s9, %s535_s9 }
  0x4e   :  { %278 = vmatpush1.bf16.msra.mxu0 %v190_v56  ;;  %v386_v56 = vunpack.c.l.s4 %v573_v55 }
  0x4f   :  { %p542_p13 = por %p541_p12, %p540_p11 }
  0x51   :  { %p543_p0 = pnand %p542_p13, %p536_p10 }
 0x114   :  { %v114_v62 = vpop.f32.mrb[0].mxu0 }
 0x115   :  { %v115_v63 = vadd.f32 %v428_v61, %v114_v62  ;;  %v443_v0 = vpop.f32.mrb[1].mxu0 }
 0x116   :  { %v117_v3 = vpop.f32.mrb[2].mxu0 }
 0x117   :  { %v120_v6 = vmax.f32 %v115_v63, 0.0  ;;  %v444_v7 = vpop.f32.mrb[3].mxu0  ;;  %v387_v63 = vunpack.c.0.s8 %v386_v56 }
 0x119   :  { %v121_v9 = vpack.c.bf16 %v120_v6, %v120_v6 }
 0x11b   :  { %430 = vmatmul.mubr.msk.bf16.vlgmr.msra.gmra.mrb[0].mxu1 %vm226_vm2, %v121_v9  ;;  %431 = vmatmul.mubr.msk.bf16.vlgmr.msra.gmra.mrb[4].mxu0 %vm226_vm2, %v121_v9 }
 0x11c   :  { %313 = vmatpush1.bf16.msra.mxu1 %v174_v8  ;;  %344 = vmatprep.mubr.bf16.mxu1 %v572_v60 }
 0x11d   :  { %314 = vmatprep.subr.bf16.mxu1 %v181_v10 }
 0x120   :  { %315 = vmatpush1.bf16.msra.mxu1 %v180_v15  ;;  %v390_v15 = vsub.s32 %v387_v63, %v197_v27 }
 0x121   :  { %316 = vmatprep.subr.bf16.mxu1 %v187_v16 }
 0x124   :  { %317 = vmatpush1.bf16.msra.mxu1 %v186_v21 }
 0x125   :  { %318 = vmatprep.subr.bf16.mxu1 %v193_v22 }
 0x128   :  { %319 = vmatpush1.bf16.msra.mxu1 %v192_v25 }
 0x12b   :  { %432 = vmatmul.mubr.msk.bf16.vlgmr.msra.gmra.mrb[4].mxu1 %vm226_vm2, %v121_v9 }
 0x1ee   :  { %v264_v37 = vpop.f32.mrb[0].mxu1  ;;  %v305_v38 = vpop.f32.mrb[4].mxu0 }
 0x1ef   :  { %v265_v39 = vadd.f32 %v264_v37, %v199_v33  ;;  %v306_v40 = vadd.f32 %v305_v38, %v207_v34  ;;  %v266_v41 = vpop.f32.mrb[1].mxu1  ;;  %v307_v42 = vpop.f32.mrb[5].mxu0 }
 0x1f0   :  { %v267_v43 = vadd.f32 %v266_v41, %v203_v35  ;;  %v308_v44 = vadd.f32 %v307_v42, %v211_v36  ;;  %v268_v45 = vpop.f32.mrb[2].mxu1  ;;  %v309_v46 = vpop.f32.mrb[6].mxu0 }
 0x1f1   :  { %v353_v47 = vmul.f32 0.5, %v265_v39  ;;  %v355_v48 = vmul.f32 0.5, %v306_v40  ;;  %v269_v49 = vpop.f32.mrb[3].mxu1  ;;  %v310_v50 = vpop.f32.mrb[7].mxu0 }
 0x1f2   :  { %v354_v51 = vmul.f32 0.5, %v267_v43  ;;  %v356_v52 = vmul.f32 0.5, %v308_v44 }
 0x1f3   :  { %457 = vtanh.f32 %v353_v47 }
 0x1f4   :  { %459 = vtanh.f32 %v355_v48 }
 0x1f5   :  { %461 = vtanh.f32 %v354_v51 }
 0x1f6   :  { %463 = vtanh.f32 %v356_v52 }
 0x1fd   :  { %v458_v59 = vpop.eup %457 }
 0x1fe   :  { %v460_v60 = vpop.eup %459  ;;  %v365_v61 = vmul.f32 0.5, %v458_v59  ;;  %v346_v62 = vpop.f32.mrb[4].mxu1 }
 0x1ff   :  { %v462_v0 = vpop.eup %461  ;;  %v367_v1 = vmul.f32 0.5, %v460_v60  ;;  %v347_v2 = vadd.f32 %v346_v62, %v215_v57  ;;  %v348_v3 = vpop.f32.mrb[5].mxu1 }
 0x200   :  { %v464_v4 = vpop.eup %463  ;;  %v371_v5 = vadd.f32 0.5, %v365_v61  ;;  %v366_v6 = vmul.f32 0.5, %v462_v0  ;;  %v349_v7 = vadd.f32 %v348_v3, %v219_v58  ;;  %v350_v8 = vpop.f32.mrb[6].mxu1 }
 0x201   :  { %v373_v9 = vadd.f32 0.5, %v367_v1  ;;  %v368_v10 = vmul.f32 0.5, %v464_v4  ;;  %v357_v11 = vmul.f32 0.5, %v347_v2  ;;  %v351_v12 = vpop.f32.mrb[7].mxu1 }
 0x202   :  { %v372_v13 = vadd.f32 0.5, %v366_v6  ;;  %v358_v14 = vmul.f32 0.5, %v349_v7 }
 0x203   :  { %v374_v16 = vadd.f32 0.5, %v368_v10  ;;  %465 = vtanh.f32 %v357_v11 }
 0x204   :  { %v383_v17 = vcombine.low %v371_v5, %v372_v13  ;;  %467 = vtanh.f32 %v358_v14 }
 0x205   :  { %v384_v18 = vcombine.low %v373_v9, %v374_v16 }
 0x206   :  { %v391_v19 = vrot.slane %v383_v17, %v390_v15 }
 0x207   :  { %v398_v20 = vrot.slane %v384_v18, %v390_v15 }
 0x209   :  { %v399_v21 = vcombine.low %v391_v19, %v398_v20 }
 0x20b   :  { %410 = vst [vmem:[#allocation8] sm:$0xff] %v399_v21 }
 0x20d   :  { %v466_v22 = vpop.eup %465 }
 0x20e   :  { %v468_v23 = vpop.eup %467  ;;  %v369_v24 = vmul.f32 0.5, %v466_v22 }
 0x20f   :  { %v370_v25 = vmul.f32 0.5, %v468_v23 }
 0x210   :  { %v375_v26 = vadd.f32 0.5, %v369_v24 }
 0x211   :  { %v376_v28 = vadd.f32 0.5, %v370_v25 }
 0x213   :  { %v400_v29 = vcombine.low %v375_v26, %v376_v28 }
 0x215   :  { %433 = vst.sshfl [vmem:[#allocation8 + $0x8] sm:$0x33 pattern:$0x76325410] %v400_v29 }
 0x216   :  { %546 = shalt.err (!%p543_p0)
}
 0x217   :  { %s547_s12 = scalar_lea.hbm %s667_s5, 192 }
 0x218   :  { %p548_p1 = scmp.ne.s32.totalorder %s667_s5, %s547_s12  ;;  %p551_p2 = scmp.lt.u32.totalorder %s547_s12, %s667_s5 }
 0x21a   :  { %p553_p3 = pnand %p551_p2, %p548_p1 }
 0x21c   :  { %556 = shalt.err (!%p553_p3)
}
 0x21d   :  { %421 = dma.vmem_to_hbm [thread:$0]  %s419_s8, 192, %s667_s5, [#allocation4]  }
 0x21e   :  { %561 = dma.done.wait [#allocation4], 192  }
 0x21f   :  { %562 = vsyncadd [#allocation4], 4294967104 }
 0x220   :  { %425 = vsyncpa [#allocation3], 1 }
 0x221   :  { %426 = vsyncpa [#allocation6], 1 }
 0x222   :  { %427 = vsyncpa [#allocation4], 1 }

</bundles_post_ra>
